<compile_context>
chip_gen: v5e
topology: v5e:2x2
jax: 0.10.0
libtpu: 0.0.40
codegen_flags: <defaults>
</compile_context>

<pallas_src>
import functools

import jax
import jax.numpy as jnp
from jax.experimental import pallas as pl
from jax.experimental.pallas import tpu as pltpu

EPS = 1e-5  # BatchNorm eps (PyTorch default)
_VMEM_LIMIT = 32 * 1024 * 1024


def _gelu_tanh(y):
    # TODO(synk): PyTorch nn.GELU() default is the exact erf form; tanh
    # approximation used here (erf lowering on Mosaic not guaranteed).
    c = jnp.float32(0.7978845608028654)  # sqrt(2/pi)
    return 0.5 * y * (1.0 + jnp.tanh(c * (y + 0.044715 * y * y * y)))


# ---------------------------------------------------------------------------
# Pallas kernels
# ---------------------------------------------------------------------------
def _shift_mm_kernel(*refs, n_taps, m_out, apply_gelu):
    """o[r] = act( sum_t x[r + t] @ W_t + shift ),  r = 0..m_out-1.

    refs = (x_ref, w_ref_0 .. w_ref_{n_taps-1}, shift_ref, o_ref).
    x_ref holds m_out + n_taps - 1 rows (caller zero-pads), so every shifted
    window is a static slice of the VMEM-resident activation -- no HBM im2col.
    """
    x_ref = refs[0]
    w_refs = refs[1:1 + n_taps]
    shift_ref = refs[1 + n_taps]
    o_ref = refs[2 + n_taps]

    x = x_ref[...]
    acc = jnp.dot(x[0:m_out, :].astype(jnp.bfloat16), w_refs[0][...],
                  preferred_element_type=jnp.float32)
    for t in range(1, n_taps):
        acc = acc + jnp.dot(x[t:t + m_out, :].astype(jnp.bfloat16),
                            w_refs[t][...], preferred_element_type=jnp.float32)
    y = acc + shift_ref[...]
    if apply_gelu:
        y = _gelu_tanh(y)
    o_ref[...] = y.astype(o_ref.dtype)


def shifted_mm(x_rows, weights, shift, m_out, *, apply_gelu):
    """x_rows: (m_out + n_taps - 1, K) f32; weights: list of (K, N) bf16
    (BN scale pre-folded); shift: (1, N) f32  ->  (m_out, N) f32."""
    n_taps = len(weights)
    K = x_rows.shape[1]
    N = weights[0].shape[1]
    kern = functools.partial(_shift_mm_kernel, n_taps=n_taps, m_out=m_out,
                             apply_gelu=apply_gelu)
    return pl.pallas_call(
        kern,
        out_shape=jax.ShapeDtypeStruct((m_out, N), jnp.float32),
        cost_estimate=pl.CostEstimate(
            flops=2 * m_out * K * N * n_taps,
            transcendentals=m_out * N if apply_gelu else 0,
            bytes_accessed=4 * (int(x_rows.size) + m_out * N + N)
            + 2 * sum(int(w.size) for w in weights)),
        compiler_params=pltpu.CompilerParams(vmem_limit_bytes=_VMEM_LIMIT),
    )(x_rows, *weights, shift)


def _mm_kernel(x_ref, w_ref, shift_ref, o_ref, *, apply_gelu):
    acc = jnp.dot(x_ref[...].astype(jnp.bfloat16), w_ref[...],
                  preferred_element_type=jnp.float32)
    y = acc + shift_ref[...]
    if apply_gelu:
        y = _gelu_tanh(y)
    o_ref[...] = y.astype(o_ref.dtype)


def fused_mm(x, w, shift, *, apply_gelu):
    """x: (M, K) f32, w: (K, N) bf16 (scale pre-folded), shift: (1, N) f32."""
    M, K = x.shape
    N = w.shape[1]
    tm = M if M <= 512 else 512          # M-tiled grid once M grows
    grid = (pl.cdiv(M, tm),)
    kern = functools.partial(_mm_kernel, apply_gelu=apply_gelu)
    return pl.pallas_call(
        kern,
        out_shape=jax.ShapeDtypeStruct((M, N), jnp.float32),
        grid=grid,
        in_specs=[pl.BlockSpec((tm, K), lambda i: (i, 0)),
                  pl.BlockSpec((K, N), lambda i: (0, 0)),
                  pl.BlockSpec((1, N), lambda i: (0, 0))],
        out_specs=pl.BlockSpec((tm, N), lambda i: (i, 0)),
        cost_estimate=pl.CostEstimate(
            flops=2 * M * K * N,
            transcendentals=M * N if apply_gelu else 0,
            bytes_accessed=4 * (M * K + M * N + N) + 2 * K * N),
        compiler_params=pltpu.CompilerParams(
            dimension_semantics=("parallel",), vmem_limit_bytes=_VMEM_LIMIT),
    )(x, w, shift)


# ---------------------------------------------------------------------------
# Deterministic parameter construction (PyTorch-shaped, pre-folded for kernels)
# ---------------------------------------------------------------------------
def _normal(key, shape, scale=0.1):
    return (scale * jax.random.normal(key, shape)).astype(jnp.float32)


def _bn_fold(keys, cout, bias):
    # BatchNorm1d evaluated in inference mode; affine folded into scale/shift.
    gamma = 1.0 + _normal(keys[0], (cout,))
    beta = _normal(keys[1], (cout,))
    run_mean = _normal(keys[2], (cout,))
    run_var = 1.0 + 0.1 * jax.random.uniform(keys[3], (cout,), jnp.float32)
    scale = gamma / jnp.sqrt(run_var + EPS)
    shift = (bias - run_mean) * scale + beta
    return scale[None, :], shift[None, :]


def init_conv_bn(key, cin, cout):
    ks = jax.random.split(key, 6)
    w = _normal(ks[0], (cout, cin, 3))            # PyTorch Conv1d weight layout
    b = _normal(ks[1], (cout,))
    scale, shift = _bn_fold(ks[2:6], cout, b)
    wk = [w[:, :, k].T * scale for k in range(3)]           # (cin, cout), BN folded
    z = jnp.zeros((cin, cout), jnp.float32)
    # out[m] = pair(x_p[2m], x_p[2m+1]) @ wa + pair(x_p[2m+2], x_p[2m+3]) @ wb
    wa = jnp.concatenate([wk[0], wk[1]], axis=0)            # (2cin, cout)
    wb = jnp.concatenate([wk[2], z], axis=0)                # (2cin, cout)
    return {"wa": wa.astype(jnp.bfloat16), "wb": wb.astype(jnp.bfloat16),
            "shift": shift}


def init_tconv_bn(key, cin, cout):
    ks = jax.random.split(key, 6)
    w = _normal(ks[0], (cin, cout, 3))            # PyTorch ConvTranspose1d layout
    b = _normal(ks[1], (cout,))
    scale, shift = _bn_fold(ks[2:6], cout, b)
    w0, w1, w2 = (w[:, :, k] * scale for k in range(3))     # (cin, cout), BN folded
    z = jnp.zeros((cin, cout), jnp.float32)
    # fused even|odd outputs: out_eo[m] = x[m] @ wa + x[m+1] @ wb
    #   even cols: x[m] @ W1 ; odd cols: x[m] @ W2 + x[m+1] @ W0
    wa = jnp.concatenate([w1, w2], axis=1)                  # (cin, 2cout)
    wb = jnp.concatenate([z, w0], axis=1)                   # (cin, 2cout)
    return {"wa": wa.astype(jnp.bfloat16), "wb": wb.astype(jnp.bfloat16),
            "shift": jnp.concatenate([shift, shift], axis=1)}


def init_linear(key, din, dout):
    k0, k1 = jax.random.split(key)
    w = _normal(k0, (dout, din))
    b = _normal(k1, (dout,))
    return {"w": w.T.astype(jnp.bfloat16), "shift": b[None, :]}


def init_final_conv(key, cin):
    k0, k1 = jax.random.split(key)
    w = _normal(k0, (1, cin, 3))
    b = _normal(k1, (1,))
    wk = [w[:, :, k].T.astype(jnp.bfloat16) for k in range(3)]   # (cin, 1) each
    return {"w0": wk[0], "w1": wk[1], "w2": wk[2], "shift": b[None, :]}


def init_lhfae_params(key, *, L, in_channels, hid_dims_l, hid_dims_h,
                      latent_dim_l, latent_dim_h, n_enc_h, embL_l, embL_h):
    def make_enc(k, hid_dims, embL, latent):
        ks = jax.random.split(k, len(hid_dims) + 1)
        convs, cin = [], in_channels
        for i, cout in enumerate(hid_dims):
            convs.append(init_conv_bn(ks[i], cin, cout))
            cin = cout
        return {"convs": convs,
                "out": init_linear(ks[-1], hid_dims[-1] * embL, latent)}

    def make_dec(k, hid_dims, embL, latent):
        rev = tuple(reversed(hid_dims))
        ks = jax.random.split(k, len(rev) + 2)
        dec_in = init_linear(ks[0], latent, rev[0] * embL)
        tconvs = [init_tconv_bn(ks[1 + i], rev[i], rev[i + 1])
                  for i in range(len(rev) - 1)]
        tconvs.append(init_tconv_bn(ks[len(rev)], rev[-1], rev[-1]))  # final tconv
        final = init_final_conv(ks[len(rev) + 1], rev[-1])            # Conv1d(C->1)
        return {"in": dec_in, "tconvs": tconvs, "final": final,
                "c0": rev[0], "embL": embL}

    keys = jax.random.split(key, 2 + 2 * n_enc_h)
    return {
        "enc_l": make_enc(keys[0], hid_dims_l, embL_l, latent_dim_l),
        "dec_l": make_dec(keys[1], hid_dims_l, embL_l, latent_dim_l),
        "encs_h": [make_enc(keys[2 + i], hid_dims_h, embL_h, latent_dim_h)
                   for i in range(n_enc_h)],
        "decs_h": [make_dec(keys[2 + n_enc_h + i], hid_dims_h, embL_h, latent_dim_h)
                   for i in range(n_enc_h)],
        "n_enc_h": n_enc_h,
        "L": L,
    }


# ---------------------------------------------------------------------------
# Layer implementations (plain-JAX glue is only reshapes/pads of tiny arrays)
# ---------------------------------------------------------------------------
def conv_bn_gelu_s2(h, p):
    """Conv1d(k=3, s=2, p=1) + BN + GELU.  h: (B, L, C) -> (B, ceil(L/2), Cout)."""
    B, L, C = h.shape
    Lout = (L - 1) // 2 + 1
    Lp = 2 * (Lout + 1)
    hp = jnp.pad(h, ((0, 0), (1, Lp - L - 1), (0, 0)))       # zero pad to even len
    pairs = hp.reshape(B * (Lout + 1), 2 * C)                # contiguous, free
    pairs = jnp.pad(pairs, ((0, 1), (0, 0)))                 # row for the +1 window
    m_out = B * (Lout + 1)
    out = shifted_mm(pairs, [p["wa"], p["wb"]], p["shift"], m_out, apply_gelu=True)
    return out.reshape(B, Lout + 1, -1)[:, :Lout, :]         # drop per-batch slack


def tconv_bn_gelu(h, p):
    """ConvTranspose1d(k=3, s=2, p=1, op=1) + BN + GELU; even/odd fused:
    out[2m] = x[m] @ W1 ; out[2m+1] = x[m+1] @ W0 + x[m] @ W2  (x[Lin] := 0)."""
    B, Lin, Cin = h.shape
    hp = jnp.pad(h, ((0, 0), (0, 1), (0, 0)))                # x[Lin] = 0 per batch
    x = jnp.pad(hp.reshape(B * (Lin + 1), Cin), ((0, 1), (0, 0)))
    m_out = B * (Lin + 1)
    out = shifted_mm(x, [p["wa"], p["wb"]], p["shift"], m_out, apply_gelu=True)
    cout = out.shape[-1] // 2
    out = out.reshape(B, Lin + 1, 2, cout)[:, :Lin]          # drop per-batch slack
    return out.reshape(B, 2 * Lin, cout)                     # interleave even/odd


def conv_s1(h, p):
    """Conv1d(k=3, s=1, p=1), Cout=1, no activation."""
    B, L, C = h.shape
    hp = jnp.pad(h, ((0, 0), (1, 1), (0, 0)))
    x = jnp.pad(hp.reshape(B * (L + 2), C), ((0, 2), (0, 0)))
    m_out = B * (L + 2)
    out = shifted_mm(x, [p["w0"], p["w1"], p["w2"]], p["shift"], m_out,
                     apply_gelu=False)
    return out.reshape(B, L + 2, 1)[:, :L, :]


def encode(x_ncl, enc):
    h = jnp.transpose(x_ncl, (0, 2, 1))                    # NCL -> (B, L, C)
    for lyr in enc["convs"]:
        h = conv_bn_gelu_s2(h, lyr)
    B = h.shape[0]
    flat = jnp.transpose(h, (0, 2, 1)).reshape(B, -1)      # PyTorch Flatten (C-major)
    o = enc["out"]
    return fused_mm(flat, o["w"], o["shift"], apply_gelu=False)


def decode(z, dec, L_target):
    B = z.shape[0]
    i = dec["in"]
    hflat = fused_mm(z, i["w"], i["shift"], apply_gelu=False)
    h = hflat.reshape(B, dec["c0"], dec["embL"])           # PyTorch Reshape((C, embL))
    h = jnp.transpose(h, (0, 2, 1))                        # -> (B, embL, C)
    for lyr in dec["tconvs"]:
        h = tconv_bn_gelu(h, lyr)
    h = conv_s1(h, dec["final"])                           # (B, Lcur, 1)
    out = jnp.transpose(h, (0, 2, 1))                      # -> (B, 1, Lcur)
    Lcur = out.shape[-1]
    if Lcur != L_target:                                   # nn.Upsample(size=(L,)), nearest
        idx = (jnp.arange(L_target) * Lcur) // L_target
        out = out[:, :, idx]
    return out


def lhfae_forward(params, x):
    """x: (B, in_channels, L) float32 (PyTorch NCL layout)."""
    L = params["L"]
    z_l = encode(x, params["enc_l"])
    recons_l = decode(z_l, params["dec_l"], L)

    # residual = (x - recons_l).detach(); recons_h = zeros_like(x)
    # tiny elementwise updates stay in plain XLA (no pallas_call dispatch cost).
    residual = x - recons_l
    recons_h = jnp.zeros_like(x)
    for i in range(params["n_enc_h"]):
        z_h = encode(residual, params["encs_h"][i])
        r_h = decode(z_h, params["decs_h"][i], L)
        recons_h = recons_h + r_h
        residual = residual - r_h

    return (recons_l, z_l), (recons_h,), residual


# ---------------------------------------------------------------------------
if __name__ == "__main__":
    B = 2
    L = 16
    in_channels = 1
    hid_dims_l = (8, 16, 32)
    hid_dims_h = (4, 8, 16)
    latent_dim_l = 8
    latent_dim_h = 8
    n_enc_h = 3
    embL = L // (2 ** 3)      # three stride-2 conv layers per encoder

    root = jax.random.PRNGKey(0)
    k_params, k_x = jax.random.split(root)
    params = init_lhfae_params(
        k_params, L=L, in_channels=in_channels,
        hid_dims_l=hid_dims_l, hid_dims_h=hid_dims_h,
        latent_dim_l=latent_dim_l, latent_dim_h=latent_dim_h,
        n_enc_h=n_enc_h, embL_l=embL, embL_h=embL)

    x = jax.random.normal(k_x, (B, in_channels, L), jnp.float32)

    (recons_l, z_l), (recons_h,), residual = lhfae_forward(params, x)
    jax.block_until_ready((recons_l, z_l, recons_h, residual))

    assert recons_l.shape == (B, in_channels, L)
    assert z_l.shape == (B, latent_dim_l)
    assert recons_h.shape == (B, in_channels, L)
    assert residual.shape == (B, in_channels, L)
    print("KERNEL_OK")
</pallas_src>

<mosaic_0001>
module attributes {stable_mosaic.version = 11 : i64} {
  func.func @_shift_mm_kernel(%arg0: memref<19x2xf32, #tpu.memory_space<vmem>>, %arg1: memref<2x8xbf16, #tpu.memory_space<vmem>>, %arg2: memref<2x8xbf16, #tpu.memory_space<vmem>>, %arg3: memref<1x8xf32, #tpu.memory_space<vmem>>, %arg4: memref<18x8xf32, #tpu.memory_space<vmem>>) attributes {dimension_semantics = [], scalar_prefetch = 0 : i64, scratch_operands = 0 : i64, tpu.core_type = #tpu.core_type<tc>} {
    %c0 = arith.constant 0 : index
    %c0_0 = arith.constant 0 : index
    %0 = vector.load %arg0[%c0, %c0_0] : memref<19x2xf32, #tpu.memory_space<vmem>>, vector<19x2xf32>
    %1 = vector.extract_strided_slice %0 {offsets = [0, 0], sizes = [18, 2], strides = [1, 1]} : vector<19x2xf32> to vector<18x2xf32>
    %2 = arith.truncf %1 : vector<18x2xf32> to vector<18x2xbf16>
    %c0_1 = arith.constant 0 : index
    %c0_2 = arith.constant 0 : index
    %3 = vector.load %arg1[%c0_1, %c0_2] : memref<2x8xbf16, #tpu.memory_space<vmem>>, vector<2x8xbf16>
    %cst = arith.constant dense<0.000000e+00> : vector<18x8xf32>
    %4 = tpu.matmul %2, %3, %cst {dimension_numbers = #tpu.dot_dimension_numbers<[1], [0], [0], [1], [0, 0, 1, 1], [], []>} : vector<18x2xbf16>, vector<2x8xbf16>, vector<18x8xf32> -> vector<18x8xf32>
    %5 = vector.extract_strided_slice %0 {offsets = [1, 0], sizes = [18, 2], strides = [1, 1]} : vector<19x2xf32> to vector<18x2xf32>
    %6 = arith.truncf %5 : vector<18x2xf32> to vector<18x2xbf16>
    %c0_3 = arith.constant 0 : index
    %c0_4 = arith.constant 0 : index
    %7 = vector.load %arg2[%c0_3, %c0_4] : memref<2x8xbf16, #tpu.memory_space<vmem>>, vector<2x8xbf16>
    %cst_5 = arith.constant dense<0.000000e+00> : vector<18x8xf32>
    %8 = tpu.matmul %6, %7, %cst_5 {dimension_numbers = #tpu.dot_dimension_numbers<[1], [0], [0], [1], [0, 0, 1, 1], [], []>} : vector<18x2xbf16>, vector<2x8xbf16>, vector<18x8xf32> -> vector<18x8xf32>
    %9 = arith.addf %4, %8 : vector<18x8xf32>
    %c0_6 = arith.constant 0 : index
    %c0_7 = arith.constant 0 : index
    %10 = vector.load %arg3[%c0_6, %c0_7] : memref<1x8xf32, #tpu.memory_space<vmem>>, vector<1x8xf32>
    %11 = vector.broadcast %10 : vector<1x8xf32> to vector<18x8xf32>
    %12 = arith.addf %9, %11 : vector<18x8xf32>
    %cst_8 = arith.constant 5.000000e-01 : f32
    %13 = vector.broadcast %cst_8 : f32 to vector<18x8xf32>
    %14 = arith.mulf %13, %12 : vector<18x8xf32>
    %cst_9 = arith.constant 4.471500e-02 : f32
    %15 = vector.broadcast %cst_9 : f32 to vector<18x8xf32>
    %16 = arith.mulf %15, %12 : vector<18x8xf32>
    %17 = arith.mulf %16, %12 : vector<18x8xf32>
    %18 = arith.mulf %17, %12 : vector<18x8xf32>
    %19 = arith.addf %12, %18 : vector<18x8xf32>
    %cst_10 = arith.constant 0.797884583 : f32
    %20 = vector.broadcast %cst_10 : f32 to vector<18x8xf32>
    %21 = arith.mulf %20, %19 : vector<18x8xf32>
    %22 = math.tanh %21 : vector<18x8xf32>
    %cst_11 = arith.constant 1.000000e+00 : f32
    %23 = vector.broadcast %cst_11 : f32 to vector<18x8xf32>
    %24 = arith.addf %23, %22 : vector<18x8xf32>
    %25 = arith.mulf %14, %24 : vector<18x8xf32>
    %c0_12 = arith.constant 0 : index
    %c0_13 = arith.constant 0 : index
    %26 = vector.load %arg4[%c0_12, %c0_13] : memref<18x8xf32, #tpu.memory_space<vmem>>, vector<18x8xf32>
    tpu.vector_store %arg4[%c0_12, %c0_13], %25 {strides = array<i32>} : memref<18x8xf32, #tpu.memory_space<vmem>>, vector<18x8xf32>,
    return
  }
}

</mosaic_0001>

<bundles_post_ra>
// kernel: tpu_custom_call.1
= control target key start
LH: loop header
LB: loop body
LE: loop exit
PB: predicated region body
PF: predicated region fallthrough
CT: control target
= control target key end

     0   :  { %vm48_vm0 = vcmask 1040384   ;;  %vm41_vm1 = vcmask 15360   ;;  %vm25_vm2 = vsmask.f32 7424  ;;  %vm129_vm3 = vcmask 64512   ;;  %s207_s1 = inlined_call_operand.vmem [shape: bf16[2,8], index: 1, kind: input, shape index: {}]   ;;  %s208_s0 = inlined_call_operand.vmem [shape: f32[19,2], index: 0, kind: input, shape index: {}]   ;;  %s209_s2 = inlined_call_operand.vmem [shape: bf16[2,8], index: 2, kind: input, shape index: {}]   ;;  %s210_s3 = inlined_call_operand.vmem [shape: f32[1,8], index: 3, kind: input, shape index: {}]   ;;  %s211_s4 = inlined_call_operand.vmem [shape: f32[18,8], index: 4, kind: output, shape index: {}]  }
   0x1   :  { %v23_v0 = vld [vmem:[%s207_s1] sm:$0x1]  ;;  %v19_v2 = vld [vmem:[%s208_s0 + $0x8] sm:$0xff]  ;;  %v20_v5 = vld [vmem:[%s208_s0 + $0x10] sm:$0x7]  ;;  %vm132_vm4 = vcmask 58368  }
   0x2   :  { %v18_v1 = vld [vmem:[%s208_s0] sm:$0xff]  ;;  %v75_v3 = vsel %vm48_vm0, %v23_v0, 0  ;;  %v22_v7 = vpack.c.bf16 %v20_v5, %v20_v5 }
   0x3   :  { %v21_v4 = vpack.c.bf16 %v19_v2, %v18_v1  ;;  %v24_v6 = vld [vmem:[%s209_s2] sm:$0x1]  ;;  %84 = vmatpush.bf16.msra.mxu1 %v75_v3  ;;  %143 = vmatpush.bf16.msra.mxu3 %v75_v3 }
   0x4   :  { %v50_v8 = vsel %vm48_vm0, %v24_v6, 0  ;;  %v34_v11 = vshll.u32 %v22_v7, 16  ;;  %v38_v12 = vshrl.u32 %v22_v7, 16  ;;  %v144_v19 = vld [vmem:[%s210_s3] ss:$0 sm:$0xff] }
   0x5   :  { %v29_v9 = vshll.u32 %v21_v4, 16  ;;  %142 = vmatpush.bf16.msra.mxu2 %v50_v8  ;;  %59 = vmatpush.bf16.msra.mxu0 %v50_v8  ;;  %v27_v10 = vshrl.u32 %v21_v4, 16 }
   0x6   :  { %140 = vmatmul.msk.bf16.vlgmr.msra.gmra.mxu1 %vm41_vm1, %v21_v4  ;;  %141 = vmatmul.msk.bf16.vlgmr.msra.gmra.mxu3 %vm41_vm1, %v22_v7  ;;  %v36_v14 = vrot.slane %v34_v11, 1 }
   0x7   :  { %v31_v13 = vrot.slane %v29_v9, 1 }
   0x8   :  { %v40_v16 = vor.u32 %v38_v12, %v36_v14 }
   0x9   :  { %v32_v15 = vor.u32 %v31_v13, %v27_v10 }
   0xa   :  { %139 = vmatmul.msk.bf16.vlgmr.msra.gmra.mxu2 %vm41_vm1, %v40_v16 }
   0xb   :  { %v37_v17 = vsel %vm25_vm2, %v32_v15, %v36_v14 }
   0xc   :  { %138 = vmatmul.msk.bf16.vlgmr.msra.gmra.mxu0 %vm41_vm1, %v37_v17 }
  0x83   :  { %v86_v18 = vpop.f32.mrf.mxu1 }
  0x89   :  { %v61_v20 = vpop.f32.mrf.mxu0  ;;  %v91_v22 = vpop.f32.mrf.mxu3 }
  0x8a   :  { %v87_v21 = vadd.f32 %v86_v18, %v61_v20 }
  0x8b   :  { %v88_v28 = vpop.f32.mrf.mxu1 }
  0x8c   :  { %v99_v23 = vadd.f32 %v144_v19, %v87_v21 }
  0x8d   :  { %v66_v25 = vpop.f32.mrf.mxu2 }
  0x8e   :  { %v105_v24 = vmul.f32 0.044715, %v99_v23  ;;  %v92_v27 = vadd.f32 %v91_v22, %v66_v25  ;;  %v102_v49 = vmul.f32 0.5, %v99_v23 }
  0x90   :  { %v108_v26 = vmul.f32 %v105_v24, %v99_v23  ;;  %v101_v31 = vadd.f32 %v144_v19, %v92_v27 }
  0x91   :  { %v63_v29 = vpop.f32.mrf.mxu0  ;;  %v93_v33 = vpop.f32.mrf.mxu3 }
  0x92   :  { %v111_v30 = vmul.f32 %v108_v26, %v99_v23  ;;  %v89_v32 = vadd.f32 %v88_v28, %v63_v29  ;;  %v107_v35 = vmul.f32 0.044715, %v101_v31  ;;  %v104_v53 = vmul.f32 0.5, %v101_v31 }
  0x94   :  { %v114_v34 = vadd.f32 %v111_v30, %v99_v23  ;;  %v100_v36 = vadd.f32 %v144_v19, %v89_v32  ;;  %v110_v38 = vmul.f32 %v107_v35, %v101_v31 }
  0x95   :  { %v68_v40 = vpop.f32.mrf.mxu2 }
  0x96   :  { %v117_v37 = vmul.f32 0.7978846, %v114_v34  ;;  %v106_v39 = vmul.f32 0.044715, %v100_v36  ;;  %v113_v41 = vmul.f32 %v110_v38, %v101_v31  ;;  %v103_v57 = vmul.f32 0.5, %v100_v36 }
  0x98   :  { %145 = vtanh.f32 %v117_v37  ;;  %v109_v42 = vmul.f32 %v106_v39, %v100_v36  ;;  %v116_v43 = vadd.f32 %v113_v41, %v101_v31 }
  0x9a   :  { %v112_v44 = vmul.f32 %v109_v42, %v100_v36  ;;  %v119_v45 = vmul.f32 0.7978846, %v116_v43 }
  0x9c   :  { %v115_v46 = vadd.f32 %v112_v44, %v100_v36  ;;  %147 = vtanh.f32 %v119_v45 }
  0x9e   :  { %v146_v47 = vpop.eup %145  ;;  %v118_v48 = vmul.f32 0.7978846, %v115_v46 }
  0x9f   :  { %v123_v50 = vadd.f32 1.0, %v146_v47 }
  0xa0   :  { %149 = vtanh.f32 %v118_v48 }
  0xa1   :  { %v126_v51 = vmul.f32 %v123_v50, %v102_v49 }
  0xa2   :  { %v148_v52 = vpop.eup %147 }
  0xa3   :  { %130 = vst.msk [vmem:[%s211_s4] sm:$0xff] %vm129_vm3, %v126_v51  ;;  %v125_v54 = vadd.f32 1.0, %v148_v52 }
  0xa5   :  { %v128_v56 = vmul.f32 %v125_v54, %v104_v53 }
  0xa6   :  { %v150_v55 = vpop.eup %149 }
  0xa7   :  { %v124_v58 = vadd.f32 1.0, %v150_v55  ;;  %133 = vst.msk [vmem:[%s211_s4 + $0x10] sm:$0x3] %vm132_vm4, %v128_v56 }
  0xa9   :  { %v127_v59 = vmul.f32 %v124_v58, %v103_v57 }
  0xab   :  { %131 = vst.msk [vmem:[%s211_s4 + $0x8] sm:$0xff] %vm129_vm3, %v127_v59 }

</bundles_post_ra>
